<compile_context>
chip_gen: v7x
topology: tpu7x:2x2x1
jax: 0.10.0
libtpu: 0.0.40
codegen_flags: <defaults>
</compile_context>

<pallas_src>
import jax
import jax.numpy as jnp
from jax import lax
from jax.experimental import pallas as pl
from jax.experimental.pallas import tpu as pltpu


# --------------------------------------------------------------------------
# kernel
# --------------------------------------------------------------------------
def _ce_kl_kernel(logit_ref, tgt_ref, mu_ref, s2_ref,      # inputs
                  ce_ref, kl_ref,                          # outputs
                  m_sc, l_sc, t_sc):                       # VMEM scratch
    kv = pl.program_id(1)
    nv = pl.num_programs(1)

    @pl.when(kv == 0)
    def _init():
        m_sc[...] = jnp.full_like(m_sc, -jnp.inf)
        l_sc[...] = jnp.zeros_like(l_sc)
        t_sc[...] = jnp.zeros_like(t_sc)

    x = logit_ref[...].astype(jnp.float32)        # (tm, tv)
    tgt = tgt_ref[...]                            # (tm, 1) int32, -1 = padded

    # online log-sum-exp over the vocab tiles
    m_prev = m_sc[...]
    m_new = jnp.maximum(m_prev, jnp.max(x, axis=-1, keepdims=True))
    l_sc[...] = (jnp.exp(m_prev - m_new) * l_sc[...]
                 + jnp.sum(jnp.exp(x - m_new), axis=-1, keepdims=True))
    m_sc[...] = m_new

    # accumulate the logit at the target id restricted to this vocab tile
    tv = x.shape[-1]
    vocab_ids = kv * tv + lax.broadcasted_iota(jnp.int32, x.shape, 1)
    t_sc[...] += jnp.sum(jnp.where(vocab_ids == tgt, x, 0.0),
                         axis=-1, keepdims=True)

    @pl.when(kv == nv - 1)
    def _finalize():
        lse = m_sc[...] + jnp.log(l_sc[...])
        valid = (tgt >= 0).astype(jnp.float32)          # sentinel-folded mask
        ce_ref[...] = (lse - t_sc[...]) * valid         # per-row CE, 0 for pads

        # KL term (tiny O(B*D) reduction) folded into the same kernel.
        mu = mu_ref[...].astype(jnp.float32)
        s2 = s2_ref[...].astype(jnp.float32)
        kl = jnp.sum(1.0 + s2 - jnp.exp(s2) - mu * mu)
        kl_ref[...] = jnp.zeros_like(kl_ref) + kl       # same value every block


# --------------------------------------------------------------------------
# tiling heuristics (VMEM-aware; safe on v5e / v6e / v7x)
# --------------------------------------------------------------------------
def _pick_vocab_tile(V):
    # Tile the vocab only when it is large and 128-divisible; otherwise a
    # single full-width block (block dim == array dim is always legal).
    if V % 128 != 0 or V <= 2048:
        return V
    for cand in (2048, 1024, 512, 256, 128):
        if V % cand == 0:
            return cand
    return V


def _pick_row_tile(N, tv, itemsize, target_bytes=4 << 20):
    # Largest row tile (multiple of 8) so one logit tile is ~4 MiB: past the
    # HBM-roofline knee, and the double-buffered working set (<~10 MiB) fits
    # comfortably under the scoped VMEM limit on every generation.
    tm = target_bytes // max(1, tv * itemsize)
    tm = max(8, min(1024, int(tm)))
    tm = (tm // 8) * 8
    n_up = -(-N // 8) * 8
    return max(8, min(tm, n_up))


# --------------------------------------------------------------------------
# wrapper (matches CE_KL.forward semantics)
# --------------------------------------------------------------------------
def ce_kl_forward(logit, mu, sigma2, cap, cap_len, *,
                  row_tile=None, vocab_tile=None):
    """Returns (loss_ce, loss_kl)."""
    B, T, V = logit.shape
    Bm, Dm = mu.shape
    N = B * T
    itemsize = jnp.dtype(logit.dtype).itemsize

    # pack_padded_sequence equivalent: targets with -1 sentinel on padding.
    target = cap[:, 1:].astype(jnp.int32)                    # (B, T)
    lens = (cap_len - 1).astype(jnp.int32)                   # (B,)
    t_idx = jnp.arange(T, dtype=jnp.int32)[None, :]
    tgt = jnp.where(t_idx < lens[:, None], target, -1).reshape(N, 1)

    logit2 = logit.reshape(N, V)

    tv = vocab_tile if vocab_tile is not None else _pick_vocab_tile(V)
    tm = row_tile if row_tile is not None else _pick_row_tile(N, tv, itemsize)

    n_pad = -(-N // tm) * tm
    if n_pad != N:
        # Only hit when B*T is not tile-aligned; padded rows get tgt = -1 so
        # they contribute exactly zero CE.
        logit2 = jnp.pad(logit2, ((0, n_pad - N), (0, 0)))
        tgt = jnp.pad(tgt, ((0, n_pad - N), (0, 0)), constant_values=-1)

    n_row_blocks = n_pad // tm
    n_vocab_blocks = V // tv

    ce_rows, kl_slab = pl.pallas_call(
        _ce_kl_kernel,
        out_shape=(
            jax.ShapeDtypeStruct((n_pad, 1), jnp.float32),             # per-row CE
            jax.ShapeDtypeStruct((1, n_row_blocks * 128), jnp.float32),  # KL slab
        ),
        grid_spec=pltpu.PrefetchScalarGridSpec(
            num_scalar_prefetch=0,
            grid=(n_row_blocks, n_vocab_blocks),
            in_specs=[
                pl.BlockSpec((tm, tv), lambda i, k: (i, k)),      # logits
                pl.BlockSpec((tm, 1), lambda i, k: (i, 0)),       # targets
                pl.BlockSpec((Bm, Dm), lambda i, k: (0, 0)),      # mu (fetched once)
                pl.BlockSpec((Bm, Dm), lambda i, k: (0, 0)),      # sigma2
            ],
            out_specs=[
                pl.BlockSpec((tm, 1), lambda i, k: (i, 0)),       # per-row CE
                pl.BlockSpec((1, 128), lambda i, k: (0, i)),      # KL per row block
            ],
            scratch_shapes=[pltpu.VMEM((tm, 1), jnp.float32)] * 3,  # m, l, tgt-logit
        ),
        compiler_params=pltpu.CompilerParams(
            # row axis parallel (2 TCs on v7x), vocab axis is the reduction
            dimension_semantics=("parallel", "arbitrary"),
            # raise the scoped VMEM limit above the 16/32 MiB defaults while
            # staying below v7x's 64 MiB physical VMEM
            vmem_limit_bytes=48 * 1024 * 1024,
        ),
        cost_estimate=pl.CostEstimate(
            flops=5 * n_pad * V,
            transcendentals=n_pad * V,
            bytes_accessed=n_pad * V * itemsize + n_pad * 8 + 2 * Bm * Dm * 4,
        ),
    )(logit2, tgt, mu, sigma2)

    n_valid = jnp.sum(lens).astype(jnp.float32)
    loss_ce = jnp.sum(ce_rows) / n_valid
    loss_kl = -0.5 * kl_slab[0, 0] / jnp.float32(Bm)
    return loss_ce, loss_kl


# --------------------------------------------------------------------------
# pure-JAX reference mirroring the PyTorch module
# --------------------------------------------------------------------------
def _ref_forward(logit, mu, sigma2, cap, cap_len):
    B, T, V = logit.shape
    target = cap[:, 1:]
    lens = cap_len - 1
    mask = jnp.arange(T)[None, :] < lens[:, None]
    logp = jax.nn.log_softmax(logit.astype(jnp.float32), axis=-1)
    tok_logp = jnp.take_along_axis(logp, target[..., None], axis=-1)[..., 0]
    loss_ce = jnp.sum(jnp.where(mask, -tok_logp, 0.0)) / jnp.sum(lens)
    loss_kl = -0.5 * jnp.sum(1.0 + sigma2 - jnp.exp(sigma2) - mu ** 2) / B
    return loss_ce, loss_kl


if __name__ == "__main__":
    key = jax.random.PRNGKey(0)

    def run_case(B, T, V, D, cap_len_list, **tile_kw):
        k1, k2, k3, k4 = jax.random.split(jax.random.fold_in(key, B * 1000 + V), 4)
        logit = jax.random.normal(k1, (B, T, V), dtype=jnp.float32)
        mu = jax.random.normal(k2, (B, D), dtype=jnp.float32)
        sigma2 = 0.1 * jax.random.normal(k3, (B, D), dtype=jnp.float32)
        cap = jax.random.randint(k4, (B, T + 1), 0, V, dtype=jnp.int32)
        cap_len = jnp.array(cap_len_list, dtype=jnp.int32)

        loss_ce, loss_kl = ce_kl_forward(logit, mu, sigma2, cap, cap_len, **tile_kw)
        jax.block_until_ready((loss_ce, loss_kl))

        ref_ce, ref_kl = _ref_forward(logit, mu, sigma2, cap, cap_len)
        assert jnp.allclose(loss_ce, ref_ce, rtol=1e-5, atol=1e-5), (loss_ce, ref_ce)
        assert jnp.allclose(loss_kl, ref_kl, rtol=1e-5, atol=1e-5), (loss_kl, ref_kl)

    # small shapes consistent with the module (batch=2, seq=8, vocab=32, hidden=16)
    run_case(B=2, T=8, V=32, D=16, cap_len_list=[9, 6])
    # exercises vocab tiling (online LSE across blocks), row padding, sentinel mask
    run_case(B=3, T=5, V=2304, D=8, cap_len_list=[6, 4, 2])
    # exercises multiple row blocks (parallel axis + per-block outputs) and a 2x2 grid
    run_case(B=2, T=8, V=256, D=16, cap_len_list=[9, 5], row_tile=8, vocab_tile=128)

    print("KERNEL_OK")
</pallas_src>

<mosaic_0001>
module attributes {stable_mosaic.version = 11 : i64} {
  func.func @_ce_kl_kernel(%arg0: i32, %arg1: i32, %arg2: memref<16x32xf32, #tpu.memory_space<vmem>>, %arg3: memref<16x1xi32, #tpu.memory_space<vmem>>, %arg4: memref<2x16xf32, #tpu.memory_space<vmem>>, %arg5: memref<2x16xf32, #tpu.memory_space<vmem>>, %arg6: memref<16x1xf32, #tpu.memory_space<vmem>>, %arg7: memref<1x128xf32, #tpu.memory_space<vmem>>, %arg8: memref<16x1xf32, #tpu.memory_space<vmem>>, %arg9: memref<16x1xf32, #tpu.memory_space<vmem>>, %arg10: memref<16x1xf32, #tpu.memory_space<vmem>>) attributes {dimension_semantics = [#tpu.dimension_semantics<parallel>, #tpu.dimension_semantics<arbitrary>], iteration_bounds = array<i64: 1, 1>, scalar_prefetch = 0 : i64, scratch_operands = 3 : i64, tpu.core_type = #tpu.core_type<tc>, window_params = [{transform_indices = @transform_0, window_bounds = array<i64: 16, 32>}, {transform_indices = @transform_1, window_bounds = array<i64: 16, 1>}, {pipeline_mode = #tpu.pipeline_mode<synchronous>, transform_indices = @transform_2, window_bounds = array<i64: 2, 16>}, {pipeline_mode = #tpu.pipeline_mode<synchronous>, transform_indices = @transform_3, window_bounds = array<i64: 2, 16>}, {transform_indices = @transform_4, window_bounds = array<i64: 16, 1>}, {transform_indices = @transform_5, window_bounds = array<i64: 1, 128>}]} {
    %c0_i32 = arith.constant 0 : i32
    %0 = arith.cmpi eq, %arg1, %c0_i32 : i32
    %1 = arith.extui %0 : i1 to i32
    %c0_i32_0 = arith.constant 0 : i32
    %2 = arith.cmpi ne, %1, %c0_i32_0 : i32
    scf.if %2 {
      %cst_21 = arith.constant 0xFF800000 : f32
      %37 = vector.broadcast %cst_21 : f32 to vector<16x1xf32>
      %c0_22 = arith.constant 0 : index
      %c0_23 = arith.constant 0 : index
      %38 = vector.load %arg8[%c0_22, %c0_23] : memref<16x1xf32, #tpu.memory_space<vmem>>, vector<16x1xf32>
      tpu.vector_store %arg8[%c0_22, %c0_23], %37 {strides = array<i32>} : memref<16x1xf32, #tpu.memory_space<vmem>>, vector<16x1xf32>,
      %cst_24 = arith.constant 0.000000e+00 : f32
      %39 = vector.broadcast %cst_24 : f32 to vector<16x1xf32>
      %c0_25 = arith.constant 0 : index
      %c0_26 = arith.constant 0 : index
      %40 = vector.load %arg9[%c0_25, %c0_26] : memref<16x1xf32, #tpu.memory_space<vmem>>, vector<16x1xf32>
      tpu.vector_store %arg9[%c0_25, %c0_26], %39 {strides = array<i32>} : memref<16x1xf32, #tpu.memory_space<vmem>>, vector<16x1xf32>,
      %cst_27 = arith.constant 0.000000e+00 : f32
      %41 = vector.broadcast %cst_27 : f32 to vector<16x1xf32>
      %c0_28 = arith.constant 0 : index
      %c0_29 = arith.constant 0 : index
      %42 = vector.load %arg10[%c0_28, %c0_29] : memref<16x1xf32, #tpu.memory_space<vmem>>, vector<16x1xf32>
      tpu.vector_store %arg10[%c0_28, %c0_29], %41 {strides = array<i32>} : memref<16x1xf32, #tpu.memory_space<vmem>>, vector<16x1xf32>,
    } else {
    }
    %c0 = arith.constant 0 : index
    %c0_1 = arith.constant 0 : index
    %3 = vector.load %arg2[%c0, %c0_1] : memref<16x32xf32, #tpu.memory_space<vmem>>, vector<16x32xf32>
    %c0_2 = arith.constant 0 : index
    %c0_3 = arith.constant 0 : index
    %4 = vector.load %arg3[%c0_2, %c0_3] : memref<16x1xi32, #tpu.memory_space<vmem>>, vector<16x1xi32>
    %c0_4 = arith.constant 0 : index
    %c0_5 = arith.constant 0 : index
    %5 = vector.load %arg8[%c0_4, %c0_5] : memref<16x1xf32, #tpu.memory_space<vmem>>, vector<16x1xf32>
    %cst = arith.constant dense<0xFF800000> : vector<16xf32>
    %6 = vector.multi_reduction <maximumf>, %3, %cst [1] : vector<16x32xf32> to vector<16xf32>
    %7 = vector.shape_cast %6 : vector<16xf32> to vector<16x1xf32>
    %8 = arith.maximumf %5, %7 : vector<16x1xf32>
    %9 = arith.subf %5, %8 : vector<16x1xf32>
    %10 = math.exp %9 : vector<16x1xf32>
    %c0_6 = arith.constant 0 : index
    %c0_7 = arith.constant 0 : index
    %11 = vector.load %arg9[%c0_6, %c0_7] : memref<16x1xf32, #tpu.memory_space<vmem>>, vector<16x1xf32>
    %12 = arith.mulf %10, %11 : vector<16x1xf32>
    %13 = vector.broadcast %8 : vector<16x1xf32> to vector<16x32xf32>
    %14 = arith.subf %3, %13 : vector<16x32xf32>
    %15 = math.exp %14 : vector<16x32xf32>
    %cst_8 = arith.constant dense<0.000000e+00> : vector<16xf32>
    %16 = vector.multi_reduction <add>, %15, %cst_8 [1] : vector<16x32xf32> to vector<16xf32>
    %17 = vector.shape_cast %16 : vector<16xf32> to vector<16x1xf32>
    %18 = arith.addf %12, %17 : vector<16x1xf32>
    %c0_9 = arith.constant 0 : index
    %c0_10 = arith.constant 0 : index
    %19 = vector.load %arg9[%c0_9, %c0_10] : memref<16x1xf32, #tpu.memory_space<vmem>>, vector<16x1xf32>
    tpu.vector_store %arg9[%c0_9, %c0_10], %18 {strides = array<i32>} : memref<16x1xf32, #tpu.memory_space<vmem>>, vector<16x1xf32>,
    %c0_11 = arith.constant 0 : index
    %c0_12 = arith.constant 0 : index
    %20 = vector.load %arg8[%c0_11, %c0_12] : memref<16x1xf32, #tpu.memory_space<vmem>>, vector<16x1xf32>
    tpu.vector_store %arg8[%c0_11, %c0_12], %8 {strides = array<i32>} : memref<16x1xf32, #tpu.memory_space<vmem>>, vector<16x1xf32>,
    %c32_i32 = arith.constant 32 : i32
    %21 = arith.muli %arg1, %c32_i32 : i32
    %22 = tpu.iota {dimensions = array<i32: 1>} : vector<16x32xi32>
    %23 = vector.broadcast %21 : i32 to vector<16x32xi32>
    %24 = arith.addi %23, %22 : vector<16x32xi32>
    %c0_13 = arith.constant 0 : index
    %c0_14 = arith.constant 0 : index
    %25 = vector.load %arg10[%c0_13, %c0_14] : memref<16x1xf32, #tpu.memory_space<vmem>>, vector<16x1xf32>
    %26 = vector.broadcast %4 : vector<16x1xi32> to vector<16x32xi32>
    %27 = arith.cmpi eq, %24, %26 : vector<16x32xi32>
    %cst_15 = arith.constant 0.000000e+00 : f32
    %28 = vector.broadcast %cst_15 : f32 to vector<16x32xf32>
    %29 = arith.select %27, %3, %28 : vector<16x32xi1>, vector<16x32xf32>
    %cst_16 = arith.constant dense<0.000000e+00> : vector<16xf32>
    %30 = vector.multi_reduction <add>, %29, %cst_16 [1] : vector<16x32xf32> to vector<16xf32>
    %31 = vector.shape_cast %30 : vector<16xf32> to vector<16x1xf32>
    %32 = arith.addf %25, %31 : vector<16x1xf32>
    %c0_17 = arith.constant 0 : index
    %c0_18 = arith.constant 0 : index
    %33 = vector.load %arg10[%c0_17, %c0_18] : memref<16x1xf32, #tpu.memory_space<vmem>>, vector<16x1xf32>
    tpu.vector_store %arg10[%c0_17, %c0_18], %32 {strides = array<i32>} : memref<16x1xf32, #tpu.memory_space<vmem>>, vector<16x1xf32>,
    %c0_i32_19 = arith.constant 0 : i32
    %34 = arith.cmpi eq, %arg1, %c0_i32_19 : i32
    %35 = arith.extui %34 : i1 to i32
    %c0_i32_20 = arith.constant 0 : i32
    %36 = arith.cmpi ne, %35, %c0_i32_20 : i32
    scf.if %36 {
      %c0_21 = arith.constant 0 : index
      %c0_22 = arith.constant 0 : index
      %37 = vector.load %arg8[%c0_21, %c0_22] : memref<16x1xf32, #tpu.memory_space<vmem>>, vector<16x1xf32>
      %c0_23 = arith.constant 0 : index
      %c0_24 = arith.constant 0 : index
      %38 = vector.load %arg9[%c0_23, %c0_24] : memref<16x1xf32, #tpu.memory_space<vmem>>, vector<16x1xf32>
      %39 = math.log %38 : vector<16x1xf32>
      %40 = arith.addf %37, %39 : vector<16x1xf32>
      %c0_i32_25 = arith.constant 0 : i32
      %41 = vector.broadcast %c0_i32_25 : i32 to vector<16x1xi32>
      %42 = arith.cmpi sge, %4, %41 : vector<16x1xi32>
      %43 = arith.extui %42 : vector<16x1xi1> to vector<16x1xi32>
      %44 = arith.sitofp %43 : vector<16x1xi32> to vector<16x1xf32>
      %c0_26 = arith.constant 0 : index
      %c0_27 = arith.constant 0 : index
      %45 = vector.load %arg10[%c0_26, %c0_27] : memref<16x1xf32, #tpu.memory_space<vmem>>, vector<16x1xf32>
      %46 = arith.subf %40, %45 : vector<16x1xf32>
      %47 = arith.mulf %46, %44 : vector<16x1xf32>
      %c0_28 = arith.constant 0 : index
      %c0_29 = arith.constant 0 : index
      %48 = vector.load %arg6[%c0_28, %c0_29] : memref<16x1xf32, #tpu.memory_space<vmem>>, vector<16x1xf32>
      tpu.vector_store %arg6[%c0_28, %c0_29], %47 {strides = array<i32>} : memref<16x1xf32, #tpu.memory_space<vmem>>, vector<16x1xf32>,
      %c0_30 = arith.constant 0 : index
      %c0_31 = arith.constant 0 : index
      %49 = vector.load %arg4[%c0_30, %c0_31] : memref<2x16xf32, #tpu.memory_space<vmem>>, vector<2x16xf32>
      %c0_32 = arith.constant 0 : index
      %c0_33 = arith.constant 0 : index
      %50 = vector.load %arg5[%c0_32, %c0_33] : memref<2x16xf32, #tpu.memory_space<vmem>>, vector<2x16xf32>
      %cst_34 = arith.constant 1.000000e+00 : f32
      %51 = vector.broadcast %cst_34 : f32 to vector<2x16xf32>
      %52 = arith.addf %51, %50 : vector<2x16xf32>
      %53 = math.exp %50 : vector<2x16xf32>
      %54 = arith.subf %52, %53 : vector<2x16xf32>
      %55 = arith.mulf %49, %49 : vector<2x16xf32>
      %56 = arith.subf %54, %55 : vector<2x16xf32>
      %57 = vector.shape_cast %56 : vector<2x16xf32> to vector<1x2x16xf32>
      %cst_35 = arith.constant dense<0.000000e+00> : vector<1xf32>
      %58 = vector.multi_reduction <add>, %57, %cst_35 [1, 2] : vector<1x2x16xf32> to vector<1xf32>
      %59 = vector.shape_cast %58 : vector<1xf32> to vector<1x1x1xf32>
      %60 = vector.extract %59[0, 0, 0] : f32 from vector<1x1x1xf32>
      %cst_36 = arith.constant 0.000000e+00 : f32
      %61 = vector.broadcast %cst_36 : f32 to vector<1x128xf32>
      %62 = vector.broadcast %60 : f32 to vector<1x128xf32>
      %63 = arith.addf %61, %62 : vector<1x128xf32>
      %c0_37 = arith.constant 0 : index
      %c0_38 = arith.constant 0 : index
      %64 = vector.load %arg7[%c0_37, %c0_38] : memref<1x128xf32, #tpu.memory_space<vmem>>, vector<1x128xf32>
      tpu.vector_store %arg7[%c0_37, %c0_38], %63 {strides = array<i32>} : memref<1x128xf32, #tpu.memory_space<vmem>>, vector<1x128xf32>,
    } else {
    }
    return
  }
  func.func @transform_0(%arg0: i32, %arg1: i32) -> (i32, i32) {
    %c0_i32 = arith.constant 0 : i32
    return %arg0, %arg1 : i32, i32
  }
  func.func @transform_1(%arg0: i32, %arg1: i32) -> (i32, i32) {
    %c0_i32 = arith.constant 0 : i32
    %c0_i32_0 = arith.constant 0 : i32
    return %arg0, %c0_i32 : i32, i32
  }
  func.func @transform_2(%arg0: i32, %arg1: i32) -> (i32, i32) {
    %c0_i32 = arith.constant 0 : i32
    %c0_i32_0 = arith.constant 0 : i32
    %c0_i32_1 = arith.constant 0 : i32
    return %c0_i32, %c0_i32_0 : i32, i32
  }
  func.func @transform_3(%arg0: i32, %arg1: i32) -> (i32, i32) {
    %c0_i32 = arith.constant 0 : i32
    %c0_i32_0 = arith.constant 0 : i32
    %c0_i32_1 = arith.constant 0 : i32
    return %c0_i32, %c0_i32_0 : i32, i32
  }
  func.func @transform_4(%arg0: i32, %arg1: i32) -> (i32, i32) {
    %c0_i32 = arith.constant 0 : i32
    %c0_i32_0 = arith.constant 0 : i32
    return %arg0, %c0_i32 : i32, i32
  }
  func.func @transform_5(%arg0: i32, %arg1: i32) -> (i32, i32) {
    %c0_i32 = arith.constant 0 : i32
    %c0_i32_0 = arith.constant 0 : i32
    return %c0_i32, %arg0 : i32, i32
  }
}

</mosaic_0001>

<bundles_post_ra>
// kernel: tpu_custom_call.1
= control target key start
LH: loop header
LB: loop body
LE: loop exit
PB: predicated region body
PF: predicated region fallthrough
CT: control target
= control target key end

     0   :  { %vm37_vm0 = vcmask 261120   ;;  %s364_s0 = inlined_call_operand.vmem [shape: f32[16,32], index: 0, kind: input, shape index: {}]   ;;  %s365_s1 = inlined_call_operand.vmem [shape: s32[16,1], index: 1, kind: input, shape index: {}]   ;;  %s366_s2 = inlined_call_operand.vmem [shape: f32[2,16], index: 2, kind: input, shape index: {}]   ;;  %s367_s3 = inlined_call_operand.vmem [shape: f32[2,16], index: 3, kind: input, shape index: {}]   ;;  %s368_s4 = inlined_call_operand.vmem [shape: f32[16,1], index: 4, kind: output, shape index: {0}]   ;;  %s369_s5 = inlined_call_operand.hbm [shape: f32[1,128], index: 5, kind: output, shape index: {1}]  }
   0x1   :  { %v264_v0 = vld [vmem:[%s364_s0] sm:$0xff]  ;;  %v269_v1 = vld [vmem:[%s364_s0 + $0x8] sm:$0xff] }
   0x2   :  { %11 = vsyncpa [#allocation6], 0  ;;  %v38_v2 = vsel %vm37_vm0, %v264_v0, -inf  ;;  %v41_v3 = vsel %vm37_vm0, %v269_v1, -inf  ;;  %vm24_vm1 = vcmask 7168   ;;  %v227_v4 = vmov -inf  }
   0x3   :  { %39 = vmax.xlane.f32.xlu0 %v38_v2  ;;  %25 = vst.msk [vmem:[#allocation2] sm:$0xff] %vm24_vm1, %v227_v4  ;;  %26 = vst.msk [vmem:[#allocation2 + $0x8] sm:$0xff] %vm24_vm1, %v227_v4  ;;  %v228_v5 = vmov 0   ;;  %v229_v6 = vmov 0.0   ;;  %v33_v7 = vld [vmem:[%s365_s1] sm:$0xff]  ;;  %v314_v17 = vld [vmem:[%s365_s1 + $0x8] sm:$0xff]  ;;  %v86_v32 = vlaneseq }
   0x4   :  { %187 = vset.pattern.permute.xlu1 %v228_v5  ;;  %188 = vset.pattern.permute.xlu0 %v228_v5  ;;  %27 = vst.msk [vmem:[#allocation3] sm:$0xff] %vm24_vm1, %v229_v6  ;;  %28 = vst.msk [vmem:[#allocation3 + $0x8] sm:$0xff] %vm24_vm1, %v229_v6  ;;  %vm125_vm2 = vcmp.ge.s32.totalorder %v33_v7, 0  ;;  %v140_v18 = vld [vmem:[%s367_s3] sm:$0x3]  ;;  %vm147_vm3 = vcmask 123904  }
   0x5   :  { %29 = vst.msk [vmem:[#allocation4] sm:$0xff] %vm24_vm1, %v229_v6  ;;  %30 = vst.msk [vmem:[#allocation4 + $0x8] sm:$0xff] %vm24_vm1, %v229_v6  ;;  %v289_v8 = vsel %vm125_vm2, 1.0, %v229_v6  ;;  %v142_v19 = vmul.f32 1.442695, %v140_v18  ;;  %v141_v20 = vadd.f32 1.0, %v140_v18 }
   0x6   :  { %v139_v22 = vld [vmem:[%s366_s2] sm:$0x3]  ;;  %v87_v35 = vand.u32 127, %v86_v32  ;;  %s230_s1 = smov [#allocation5]  }
   0x7   :  { %42 = vmax.xlane.f32.xlu0 %v41_v3  ;;  %189 = vpow2.f32 %v142_v19  ;;  %v145_v24 = vmul.f32 %v139_v22, %v139_v22  ;;  %s169_s2 = sshll.u32 %s230_s1, 4  ;;  %s170_s2 = int_to_ptr.vmem [resolvable:$true] %s169_s2 }
   0x8   :  { %s203_s29 = scalar_lea.vmem %s170_s2, 16  ;;  %s207_s30 = scalar_lea.vmem %s170_s2, 32 }
   0x9   :  { %p204_p0 = scmp.ne.s32.totalorder %s170_s2, %s203_s29  ;;  %p208_p1 = scmp.lt.s32.totalorder %s170_s2, %s170_s2 }
   0xa   :  { %v291_v9 = vld [vmem:[#allocation2] sm:$0xff]  ;;  %v296_v12 = vld [vmem:[#allocation2 + $0x8] sm:$0xff]  ;;  %p209_p2 = scmp.lt.s32.totalorder %s207_s30, %s203_s29 }
   0xc   :  { %p210_p3 = por %p209_p2, %p208_p1 }
   0xe   :  { %p211_p4 = pnand %p210_p3, %p204_p0 }
  0x11   :  { %v190_v21 = vpop.eup %189 }
  0x12   :  { %v144_v23 = vsub.f32 %v141_v20, %v190_v21 }
  0x14   :  { %v146_v25 = vsub.f32 %v144_v23, %v145_v24 }
  0x16   :  { %v148_v26 = vsel %vm147_vm3, %v146_v25, 0.0 }
  0x1d   :  { %93 = vperm.xlu0 %188, %v33_v7  }
  0x90   :  { %v40_v10 = vpop.xlane.xlu0 %39 }
  0x91   :  { %v294_v11 = vmax.f32 %v291_v9, %v40_v10 }
  0x93   :  { %v46_v13 = vsub.f32 %v291_v9, %v294_v11  ;;  %83 = vst.msk [vmem:[#allocation2] sm:$0xff] %vm24_vm1, %v294_v11  ;;  %58 = vperm.xlu1 %187, %v294_v11  }
  0x94   :  { %v43_v14 = vpop.xlane.xlu0 %42 }
  0x95   :  { %v304_v15 = vmax.f32 %v296_v12, %v43_v14 }
  0x97   :  { %v47_v16 = vsub.f32 %v296_v12, %v304_v15  ;;  %84 = vst.msk [vmem:[#allocation2 + $0x8] sm:$0xff] %vm24_vm1, %v304_v15  ;;  %63 = vperm.xlu1 %187, %v304_v15  }
  0x9b   :  { %96 = vperm.xlu1 %187, %v314_v17  }
  0x9c   :  { %v94_v34 = vpop.permute.xlu0 %93 }
  0x9d   :  { %vm98_vm4 = vcmp.eq.s32.totalorder %v87_v35, %v94_v34 }
  0x9e   :  { %v100_v38 = vsel %vm98_vm4, %v264_v0, 0.0 }
  0x9f   :  { %v102_v40 = vsel %vm37_vm0, %v100_v38, 0.0 }
  0xbf   :  { %149 = vadd.xlane.f32.xlu1 %v148_v26 }
 0x112   :  { %v59_v27 = vpop.permute.xlu1 %58 }
 0x113   :  { %v66_v28 = vsub.f32 %v264_v0, %v59_v27 }
 0x115   :  { %v68_v29 = vmul.f32 1.442695, %v66_v28 }
 0x116   :  { %v64_v30 = vpop.permute.xlu1 %63 }
 0x117   :  { %191 = vpow2.f32 %v68_v29  ;;  %v67_v31 = vsub.f32 %v269_v1, %v64_v30 }
 0x119   :  { %v70_v33 = vmul.f32 1.442695, %v67_v31 }
 0x11a   :  { %v97_v37 = vpop.permute.xlu1 %96 }
 0x11b   :  { %193 = vpow2.f32 %v70_v33  ;;  %vm99_vm5 = vcmp.eq.s32.totalorder %v87_v35, %v97_v37 }
 0x11c   :  { %v101_v43 = vsel %vm99_vm5, %v269_v1, 0.0 }
 0x11d   :  { %v105_v44 = vsel %vm37_vm0, %v101_v43, 0.0 }
 0x121   :  { %v192_v36 = vpop.eup %191 }
 0x122   :  { %v72_v39 = vsel %vm37_vm0, %v192_v36, 0.0 }
 0x123   :  { %73 = vadd.xlane.f32.xlu1 %v72_v39 }
 0x125   :  { %v194_v41 = vpop.eup %193 }
 0x126   :  { %v75_v42 = vsel %vm37_vm0, %v194_v41, 0.0 }
 0x127   :  { %103 = vadd.xlane.f32.xlu1 %v102_v40  ;;  %76 = vadd.xlane.f32.xlu0 %v75_v42 }
 0x12b   :  { %106 = vadd.xlane.f32.xlu1 %v105_v44 }
 0x14c   :  { %v150_v45 = vpop.xlane.xlu1 %149 }
 0x14d   :  { %v151_v46 = vrot.slane %v150_v45, 4 }
 0x14f   :  { %v152_v47 = vadd.f32 %v151_v46, %v150_v45 }
 0x151   :  { %v153_v48 = vrot.slane %v152_v47, 2 }
 0x153   :  { %v154_v49 = vadd.f32 %v153_v48, %v152_v47 }
 0x155   :  { %v155_v50 = vrot.slane %v154_v49, 1 }
 0x157   :  { %v156_v51 = vadd.f32 %v155_v50, %v154_v49 }
 0x159   :  { %181 = vpush %v156_v51 }
 0x18a   :  { %s182_s3 = spop %181 }
 0x18b   :  { %v158_v52 = vstv %s182_s3 }
 0x18c   :  { %160 = vst [vmem:[#allocation5] sm:$0x1] %v158_v52 }
 0x18d   :  { %214 = shalt.err (!%p211_p4)
}
 0x18e   :  { %s215_s8 = scalar_lea.hbm %s369_s5, 16 }
 0x18f   :  { %p216_p5 = scmp.ne.s32.totalorder %s369_s5, %s215_s8  ;;  %p219_p6 = scmp.lt.u32.totalorder %s215_s8, %s369_s5 }
 0x191   :  { %p221_p7 = pnand %p219_p6, %p216_p5 }
 0x193   :  { %224 = shalt.err (!%p221_p7)
}
 0x194   :  { %172 = dma.vmem_to_hbm [thread:$0]  %s170_s2, 16, %s369_s5, [#allocation6]   ;;  %v48_v53 = vmul.f32 1.442695, %v46_v13  ;;  %v50_v54 = vmul.f32 1.442695, %v47_v16 }
 0x195   :  { %v52_v56 = vld [vmem:[#allocation3] sm:$0xff]  ;;  %v53_v60 = vld [vmem:[#allocation3 + $0x8] sm:$0xff]  ;;  %v90_v62 = vld [vmem:[#allocation4] sm:$0xff]  ;;  %vm126_vm6 = vcmp.ge.s32.totalorder %v314_v17, 0 }
 0x196   :  { %195 = vpow2.f32 %v48_v53  ;;  %v91_v4 = vld [vmem:[#allocation4 + $0x8] sm:$0xff]  ;;  %v115_v13 = vld [vmem:[#allocation2] sm:$0xff]  ;;  %v180_v23 = vsel %vm126_vm6, 1.0, %v229_v6 }
 0x197   :  { %197 = vpow2.f32 %v50_v54  ;;  %v116_v20 = vld [vmem:[#allocation2 + $0x8] sm:$0xff] }
 0x1a0   :  { %v196_v55 = vpop.eup %195 }
 0x1a1   :  { %v54_v57 = vmul.f32 %v196_v55, %v52_v56  ;;  %v198_v58 = vpop.eup %197 }
 0x1a2   :  { %v55_v63 = vmul.f32 %v198_v58, %v53_v60 }
 0x1b0   :  { %v74_v59 = vpop.xlane.xlu1 %73 }
 0x1b1   :  { %v78_v61 = vadd.f32 %v74_v59, %v54_v57 }
 0x1b3   :  { %81 = vst.msk [vmem:[#allocation3] sm:$0xff] %vm24_vm1, %v78_v61 }
 0x1b4   :  { %v77_v0 = vpop.xlane.xlu0 %76  ;;  %v104_v1 = vpop.xlane.xlu1 %103 }
 0x1b5   :  { %v79_v2 = vadd.f32 %v77_v0, %v55_v63  ;;  %v108_v3 = vadd.f32 %v104_v1, %v90_v62 }
 0x1b7   :  { %82 = vst.msk [vmem:[#allocation3 + $0x8] sm:$0xff] %vm24_vm1, %v79_v2  ;;  %110 = vst.msk [vmem:[#allocation4] sm:$0xff] %vm24_vm1, %v108_v3 }
 0x1b8   :  { %v107_v5 = vpop.xlane.xlu1 %106 }
 0x1b9   :  { %v109_v7 = vadd.f32 %v107_v5, %v91_v4 }
 0x1ba   :  { %v117_v9 = vld [vmem:[#allocation3] sm:$0xff] }
 0x1bb   :  { %199 = vlog2.f32 %v117_v9  ;;  %111 = vst.msk [vmem:[#allocation4 + $0x8] sm:$0xff] %vm24_vm1, %v109_v7 }
 0x1be   :  { %v118_v10 = vld [vmem:[#allocation3 + $0x8] sm:$0xff]  ;;  %v131_v14 = vld [vmem:[#allocation4] sm:$0xff] }
 0x1bf   :  { %201 = vlog2.f32 %v118_v10 }
 0x1c2   :  { %v132_v24 = vld [vmem:[#allocation4 + $0x8] sm:$0xff] }
 0x1c5   :  { %v200_v11 = vpop.eup %199 }
 0x1c6   :  { %v120_v12 = vmul.f32 0.6931472, %v200_v11 }
 0x1c8   :  { %v123_v15 = vadd.f32 %v120_v12, %v115_v13 }
 0x1c9   :  { %v202_v16 = vpop.eup %201 }
 0x1ca   :  { %v133_v18 = vsub.f32 %v123_v15, %v131_v14  ;;  %v122_v19 = vmul.f32 0.6931472, %v202_v16 }
 0x1cc   :  { %v135_v21 = vmul.f32 %v289_v8, %v133_v18  ;;  %v124_v22 = vadd.f32 %v122_v19, %v116_v20 }
 0x1ce   :  { %137 = vst.msk [vmem:[%s368_s4] sm:$0xff] %vm24_vm1, %v135_v21  ;;  %v134_v25 = vsub.f32 %v124_v22, %v132_v24 }
 0x1d0   :  { %v136_v26 = vmul.f32 %v180_v23, %v134_v25 }
 0x1d2   :  { %138 = vst.msk [vmem:[%s368_s4 + $0x8] sm:$0xff] %vm24_vm1, %v136_v26 }
 0x1d3   :  { %225 = dma.done.wait [#allocation6], 16  }
 0x1d4   :  { %226 = vsyncadd [#allocation6], 4294967280 }
 0x1d5   :  { %178 = vsyncpa [#allocation6], 1 }

</bundles_post_ra>
